<compile_context>
chip_gen: v6e
topology: v6e:2x2x1
jax: 0.10.0
libtpu: 0.0.40
codegen_flags: <defaults>
</compile_context>

<pallas_src>
import functools
import math

import jax
import jax.numpy as jnp
from jax import lax
from jax.experimental import pallas as pl
from jax.experimental.pallas import tpu as pltpu

HIDDEN = 128
LANE = 128
SUBLANE = 8
MAX_TB = 1024             # max batch-tile rows per grid step
MEGACORE_SPLIT_MIN = 256  # force >=2 grid steps above this batch so both v7x TCs get work


def _round_up(x, m):
    return ((x + m - 1) // m) * m


def _cdiv(a, b):
    return -(-a // b)


# --------------------------------------------------------------------------------------
# Kernel bodies
# --------------------------------------------------------------------------------------
def _mlp_f32(x, w1, b1, w2, b2, w3, b3, w4, b4):
    """4-layer MLP. Matmuls run in the weights' dtype (bf16 by default) on the MXU with
    f32 accumulation; bias adds + ReLU stay in f32 on the VPU."""
    h = jnp.dot(x.astype(w1.dtype), w1, preferred_element_type=jnp.float32)
    h = jnp.maximum(h + b1, 0.0)
    h = jnp.dot(h.astype(w2.dtype), w2, preferred_element_type=jnp.float32)
    h = jnp.maximum(h + b2, 0.0)
    h = jnp.dot(h.astype(w3.dtype), w3, preferred_element_type=jnp.float32)
    h = jnp.maximum(h + b3, 0.0)
    h = jnp.dot(h.astype(w4.dtype), w4, preferred_element_type=jnp.float32)
    return h + b4


def _dqn_fwd_kernel(x_ref, w1_ref, b1_ref, w2_ref, b2_ref, w3_ref, b3_ref,
                    w4_ref, b4_ref, o_ref):
    q = _mlp_f32(x_ref[...], w1_ref[...], b1_ref[...], w2_ref[...], b2_ref[...],
                 w3_ref[...], b3_ref[...], w4_ref[...], b4_ref[...])
    o_ref[...] = q.astype(o_ref.dtype)


def _dqn_greedy_kernel(num_actions, x_ref, w1_ref, b1_ref, w2_ref, b2_ref,
                       w3_ref, b3_ref, w4_ref, b4_ref, a_ref):
    """Fused forward + greedy argmax over the (valid) action lanes. Output: (TB, 1) int32."""
    q = _mlp_f32(x_ref[...], w1_ref[...], b1_ref[...], w2_ref[...], b2_ref[...],
                 w3_ref[...], b3_ref[...], w4_ref[...], b4_ref[...])
    col = lax.broadcasted_iota(jnp.int32, q.shape, 1)
    masked = jnp.where(col < num_actions, q, -jnp.inf)          # padded lanes can't win
    m = jnp.max(masked, axis=-1, keepdims=True)
    idx = jnp.where(masked == m, col, q.shape[-1])              # first-max tie-break
    a_ref[...] = jnp.min(idx, axis=-1, keepdims=True).astype(a_ref.dtype)


# --------------------------------------------------------------------------------------
# Parameter init / preprocessing (hoisted out of the per-call forward path)
# --------------------------------------------------------------------------------------
def init_dqn_params(key, num_inputs, num_actions):
    """Deterministic init matching torch.nn.Linear default (U(-1/sqrt(fan_in), +))."""
    dims = [(num_inputs, HIDDEN), (HIDDEN, HIDDEN), (HIDDEN, HIDDEN), (HIDDEN, num_actions)]
    params = {}
    for i, (fan_in, fan_out) in enumerate(dims, start=1):
        key, kw, kb = jax.random.split(key, 3)
        bound = 1.0 / math.sqrt(fan_in)
        params[f"w{i}"] = jax.random.uniform(kw, (fan_in, fan_out), jnp.float32, -bound, bound)
        params[f"b{i}"] = jax.random.uniform(kb, (fan_out,), jnp.float32, -bound, bound)
    return params


def prepare_dqn_params(params, compute_dtype=jnp.bfloat16):
    """One-time preprocessing:
      - weights cast to compute_dtype (bf16 default: native MXU dtype on v5e/v6e/v7x),
      - biases reshaped to (1, F) f32 rows (added to the f32 accumulator),
      - w4/b4 zero-padded to a lane-dense 128-multiple output width (exact)."""
    num_actions = params["w4"].shape[1]
    act_p = _round_up(max(num_actions, LANE), LANE)
    w4_p = jnp.zeros((HIDDEN, act_p), compute_dtype).at[:, :num_actions].set(
        params["w4"].astype(compute_dtype))
    b4_p = jnp.zeros((1, act_p), jnp.float32).at[:, :num_actions].set(
        params["b4"].reshape(1, -1).astype(jnp.float32))
    return {
        "w1": params["w1"].astype(compute_dtype),
        "b1": params["b1"].reshape(1, -1).astype(jnp.float32),
        "w2": params["w2"].astype(compute_dtype),
        "b2": params["b2"].reshape(1, -1).astype(jnp.float32),
        "w3": params["w3"].astype(compute_dtype),
        "b3": params["b3"].reshape(1, -1).astype(jnp.float32),
        "w4": w4_p,
        "b4": b4_p,
    }


# --------------------------------------------------------------------------------------
# Tiling / spec helpers
# --------------------------------------------------------------------------------------
def _tiles(B):
    """Pick (TB, B_p): balanced tiles (small worst-case padding), >=2 tiles for large B
    (v7x megacore), 128-aligned M tile when it costs no extra padding (v5e MXU pass width)."""
    B_r = _round_up(max(B, SUBLANE), SUBLANE)
    n_tiles = max(1, _cdiv(B_r, MAX_TB))
    if B_r >= MEGACORE_SPLIT_MIN:
        n_tiles = max(n_tiles, 2)
    TB = _round_up(_cdiv(B_r, n_tiles), SUBLANE)
    TB_128 = _round_up(TB, LANE)
    if _round_up(B_r, TB_128) <= _round_up(B_r, TB):
        TB = TB_128
    B_p = _round_up(B_r, TB)
    return TB, B_p


def _in_specs(TB, num_inputs, act_p):
    const = lambda i: (0, 0)  # weights/biases: same block every step -> VMEM-resident, no re-DMA
    return [
        pl.BlockSpec((TB, num_inputs), lambda i: (i, 0)),   # x tile (last dim = full array dim)
        pl.BlockSpec((num_inputs, HIDDEN), const),          # w1
        pl.BlockSpec((1, HIDDEN), const),                   # b1
        pl.BlockSpec((HIDDEN, HIDDEN), const),              # w2
        pl.BlockSpec((1, HIDDEN), const),                   # b2
        pl.BlockSpec((HIDDEN, HIDDEN), const),              # w3
        pl.BlockSpec((1, HIDDEN), const),                   # b3
        pl.BlockSpec((HIDDEN, act_p), const),               # w4 (padded, lane-dense)
        pl.BlockSpec((1, act_p), const),                    # b4 (padded)
    ]


def _cost(B_p, num_inputs, act_p, weight_itemsize, out_bytes_per_row):
    flops = 2 * B_p * (num_inputs * HIDDEN + 2 * HIDDEN * HIDDEN + HIDDEN * act_p)
    bytes_accessed = (
        weight_itemsize * (B_p * num_inputs
                           + num_inputs * HIDDEN + 2 * HIDDEN * HIDDEN + HIDDEN * act_p)
        + 4 * (3 * HIDDEN + act_p)
        + B_p * out_bytes_per_row)
    return pl.CostEstimate(flops=flops, transcendentals=0, bytes_accessed=bytes_accessed)


# --------------------------------------------------------------------------------------
# Public entry points
# --------------------------------------------------------------------------------------
@functools.partial(jax.jit, static_argnames=("num_actions",))
def dqn_forward(x, prepped, num_actions):
    """x: [B, num_inputs] float32. Returns Q-values [B, num_actions] float32."""
    B, num_inputs = x.shape
    act_p = prepped["w4"].shape[1]
    cdt = prepped["w1"].dtype
    TB, B_p = _tiles(B)

    x = x.astype(cdt)                         # cast once in the wrapper, not per grid step
    if B_p != B:
        x = jnp.pad(x, ((0, B_p - B), (0, 0)))

    out_p = pl.pallas_call(
        _dqn_fwd_kernel,
        out_shape=jax.ShapeDtypeStruct((B_p, act_p), jnp.float32),
        grid=(B_p // TB,),
        in_specs=_in_specs(TB, num_inputs, act_p),
        out_specs=pl.BlockSpec((TB, act_p), lambda i: (i, 0)),
        compiler_params=pltpu.CompilerParams(dimension_semantics=("parallel",)),
        cost_estimate=_cost(B_p, num_inputs, act_p, jnp.dtype(cdt).itemsize, 4 * act_p),
    )(x, prepped["w1"], prepped["b1"], prepped["w2"], prepped["b2"],
      prepped["w3"], prepped["b3"], prepped["w4"], prepped["b4"])

    return out_p[:B, :num_actions]


@functools.partial(jax.jit, static_argnames=("num_actions",))
def dqn_greedy_actions(x, prepped, num_actions):
    """Fused forward + argmax (greedy branch of DQN.act). Returns int32 actions [B]."""
    B, num_inputs = x.shape
    act_p = prepped["w4"].shape[1]
    cdt = prepped["w1"].dtype
    TB, B_p = _tiles(B)

    x = x.astype(cdt)
    if B_p != B:
        x = jnp.pad(x, ((0, B_p - B), (0, 0)))

    out_p = pl.pallas_call(
        functools.partial(_dqn_greedy_kernel, num_actions),
        out_shape=jax.ShapeDtypeStruct((B_p, 1), jnp.int32),
        grid=(B_p // TB,),
        in_specs=_in_specs(TB, num_inputs, act_p),
        out_specs=pl.BlockSpec((TB, 1), lambda i: (i, 0)),
        compiler_params=pltpu.CompilerParams(dimension_semantics=("parallel",)),
        cost_estimate=_cost(B_p, num_inputs, act_p, jnp.dtype(cdt).itemsize, 4),
    )(x, prepped["w1"], prepped["b1"], prepped["w2"], prepped["b2"],
      prepped["w3"], prepped["b3"], prepped["w4"], prepped["b4"])

    return out_p[:B, 0]


def _reference_forward(x, params):
    h = jnp.maximum(x @ params["w1"] + params["b1"], 0.0)
    h = jnp.maximum(h @ params["w2"] + params["b2"], 0.0)
    h = jnp.maximum(h @ params["w3"] + params["b3"], 0.0)
    return h @ params["w4"] + params["b4"]


if __name__ == "__main__":
    key = jax.random.PRNGKey(0)
    num_inputs, num_actions, batch = 4, 2, 2  # CartPole-like DQN

    kp, kx = jax.random.split(key)
    params = init_dqn_params(kp, num_inputs, num_actions)
    x = jax.random.normal(kx, (batch, num_inputs), jnp.float32)

    # bf16 MXU inputs with f32 accumulation (default). Use compute_dtype=jnp.float32 for
    # tighter (1e-5-level) agreement with the f32 reference at a 2-4x MXU cost.
    prepped = prepare_dqn_params(params, compute_dtype=jnp.bfloat16)

    q = dqn_forward(x, prepped, num_actions)
    q = jax.block_until_ready(q)

    q_ref = _reference_forward(x, params)
    assert q.shape == (batch, num_actions)
    # bf16-path tolerance (f32 accumulation keeps the error at the few-1e-3 level here).
    assert jnp.allclose(q, q_ref, atol=3e-2, rtol=3e-2), (q, q_ref)

    actions = dqn_greedy_actions(x, prepped, num_actions)
    actions = jax.block_until_ready(actions)
    assert actions.shape == (batch,)
    # Both kernels run the identical bf16/f32 op sequence, so their argmax must agree.
    assert jnp.array_equal(actions, jnp.argmax(q, axis=-1).astype(jnp.int32)), (actions, q)

    print("KERNEL_OK")
</pallas_src>

<mosaic_0001>
module attributes {stable_mosaic.version = 11 : i64} {
  func.func @_dqn_fwd_kernel(%arg0: i32, %arg1: memref<8x4xbf16, #tpu.memory_space<vmem>>, %arg2: memref<4x128xbf16, #tpu.memory_space<vmem>>, %arg3: memref<1x128xf32, #tpu.memory_space<vmem>>, %arg4: memref<128x128xbf16, #tpu.memory_space<vmem>>, %arg5: memref<1x128xf32, #tpu.memory_space<vmem>>, %arg6: memref<128x128xbf16, #tpu.memory_space<vmem>>, %arg7: memref<1x128xf32, #tpu.memory_space<vmem>>, %arg8: memref<128x128xbf16, #tpu.memory_space<vmem>>, %arg9: memref<1x128xf32, #tpu.memory_space<vmem>>, %arg10: memref<8x128xf32, #tpu.memory_space<vmem>>) attributes {dimension_semantics = [#tpu.dimension_semantics<parallel>], iteration_bounds = array<i64: 1>, scalar_prefetch = 0 : i64, scratch_operands = 0 : i64, tpu.core_type = #tpu.core_type<tc>, window_params = [{transform_indices = @transform_0, window_bounds = array<i64: 8, 4>}, {pipeline_mode = #tpu.pipeline_mode<synchronous>, transform_indices = @transform_1, window_bounds = array<i64: 4, 128>}, {pipeline_mode = #tpu.pipeline_mode<synchronous>, transform_indices = @transform_2, window_bounds = array<i64: 1, 128>}, {pipeline_mode = #tpu.pipeline_mode<synchronous>, transform_indices = @transform_3, window_bounds = array<i64: 128, 128>}, {pipeline_mode = #tpu.pipeline_mode<synchronous>, transform_indices = @transform_4, window_bounds = array<i64: 1, 128>}, {pipeline_mode = #tpu.pipeline_mode<synchronous>, transform_indices = @transform_5, window_bounds = array<i64: 128, 128>}, {pipeline_mode = #tpu.pipeline_mode<synchronous>, transform_indices = @transform_6, window_bounds = array<i64: 1, 128>}, {pipeline_mode = #tpu.pipeline_mode<synchronous>, transform_indices = @transform_7, window_bounds = array<i64: 128, 128>}, {pipeline_mode = #tpu.pipeline_mode<synchronous>, transform_indices = @transform_8, window_bounds = array<i64: 1, 128>}, {transform_indices = @transform_9, window_bounds = array<i64: 8, 128>}]} {
    %c0 = arith.constant 0 : index
    %c0_0 = arith.constant 0 : index
    %0 = vector.load %arg1[%c0, %c0_0] : memref<8x4xbf16, #tpu.memory_space<vmem>>, vector<8x4xbf16>
    %c0_1 = arith.constant 0 : index
    %c0_2 = arith.constant 0 : index
    %1 = vector.load %arg2[%c0_1, %c0_2] : memref<4x128xbf16, #tpu.memory_space<vmem>>, vector<4x128xbf16>
    %c0_3 = arith.constant 0 : index
    %c0_4 = arith.constant 0 : index
    %2 = vector.load %arg3[%c0_3, %c0_4] : memref<1x128xf32, #tpu.memory_space<vmem>>, vector<1x128xf32>
    %c0_5 = arith.constant 0 : index
    %c0_6 = arith.constant 0 : index
    %3 = vector.load %arg4[%c0_5, %c0_6] : memref<128x128xbf16, #tpu.memory_space<vmem>>, vector<128x128xbf16>
    %c0_7 = arith.constant 0 : index
    %c0_8 = arith.constant 0 : index
    %4 = vector.load %arg5[%c0_7, %c0_8] : memref<1x128xf32, #tpu.memory_space<vmem>>, vector<1x128xf32>
    %c0_9 = arith.constant 0 : index
    %c0_10 = arith.constant 0 : index
    %5 = vector.load %arg6[%c0_9, %c0_10] : memref<128x128xbf16, #tpu.memory_space<vmem>>, vector<128x128xbf16>
    %c0_11 = arith.constant 0 : index
    %c0_12 = arith.constant 0 : index
    %6 = vector.load %arg7[%c0_11, %c0_12] : memref<1x128xf32, #tpu.memory_space<vmem>>, vector<1x128xf32>
    %c0_13 = arith.constant 0 : index
    %c0_14 = arith.constant 0 : index
    %7 = vector.load %arg8[%c0_13, %c0_14] : memref<128x128xbf16, #tpu.memory_space<vmem>>, vector<128x128xbf16>
    %c0_15 = arith.constant 0 : index
    %c0_16 = arith.constant 0 : index
    %8 = vector.load %arg9[%c0_15, %c0_16] : memref<1x128xf32, #tpu.memory_space<vmem>>, vector<1x128xf32>
    %cst = arith.constant dense<0.000000e+00> : vector<8x128xf32>
    %9 = tpu.matmul %0, %1, %cst {dimension_numbers = #tpu.dot_dimension_numbers<[1], [0], [0], [1], [0, 0, 1, 1], [], []>} : vector<8x4xbf16>, vector<4x128xbf16>, vector<8x128xf32> -> vector<8x128xf32>
    %10 = vector.broadcast %2 : vector<1x128xf32> to vector<8x128xf32>
    %11 = arith.addf %9, %10 : vector<8x128xf32>
    %cst_17 = arith.constant 0.000000e+00 : f32
    %12 = vector.broadcast %cst_17 : f32 to vector<8x128xf32>
    %13 = arith.maximumf %11, %12 : vector<8x128xf32>
    %14 = arith.truncf %13 : vector<8x128xf32> to vector<8x128xbf16>
    %cst_18 = arith.constant dense<0.000000e+00> : vector<8x128xf32>
    %15 = tpu.matmul %14, %3, %cst_18 {dimension_numbers = #tpu.dot_dimension_numbers<[1], [0], [0], [1], [0, 0, 1, 1], [], []>} : vector<8x128xbf16>, vector<128x128xbf16>, vector<8x128xf32> -> vector<8x128xf32>
    %16 = vector.broadcast %4 : vector<1x128xf32> to vector<8x128xf32>
    %17 = arith.addf %15, %16 : vector<8x128xf32>
    %cst_19 = arith.constant 0.000000e+00 : f32
    %18 = vector.broadcast %cst_19 : f32 to vector<8x128xf32>
    %19 = arith.maximumf %17, %18 : vector<8x128xf32>
    %20 = arith.truncf %19 : vector<8x128xf32> to vector<8x128xbf16>
    %cst_20 = arith.constant dense<0.000000e+00> : vector<8x128xf32>
    %21 = tpu.matmul %20, %5, %cst_20 {dimension_numbers = #tpu.dot_dimension_numbers<[1], [0], [0], [1], [0, 0, 1, 1], [], []>} : vector<8x128xbf16>, vector<128x128xbf16>, vector<8x128xf32> -> vector<8x128xf32>
    %22 = vector.broadcast %6 : vector<1x128xf32> to vector<8x128xf32>
    %23 = arith.addf %21, %22 : vector<8x128xf32>
    %cst_21 = arith.constant 0.000000e+00 : f32
    %24 = vector.broadcast %cst_21 : f32 to vector<8x128xf32>
    %25 = arith.maximumf %23, %24 : vector<8x128xf32>
    %26 = arith.truncf %25 : vector<8x128xf32> to vector<8x128xbf16>
    %cst_22 = arith.constant dense<0.000000e+00> : vector<8x128xf32>
    %27 = tpu.matmul %26, %7, %cst_22 {dimension_numbers = #tpu.dot_dimension_numbers<[1], [0], [0], [1], [0, 0, 1, 1], [], []>} : vector<8x128xbf16>, vector<128x128xbf16>, vector<8x128xf32> -> vector<8x128xf32>
    %28 = vector.broadcast %8 : vector<1x128xf32> to vector<8x128xf32>
    %29 = arith.addf %27, %28 : vector<8x128xf32>
    %c0_23 = arith.constant 0 : index
    %c0_24 = arith.constant 0 : index
    %30 = vector.load %arg10[%c0_23, %c0_24] : memref<8x128xf32, #tpu.memory_space<vmem>>, vector<8x128xf32>
    tpu.vector_store %arg10[%c0_23, %c0_24], %29 {strides = array<i32>} : memref<8x128xf32, #tpu.memory_space<vmem>>, vector<8x128xf32>,
    return
  }
  func.func @transform_0(%arg0: i32) -> (i32, i32) {
    %c0_i32 = arith.constant 0 : i32
    %c0_i32_0 = arith.constant 0 : i32
    return %arg0, %c0_i32 : i32, i32
  }
  func.func @transform_1(%arg0: i32) -> (i32, i32) {
    %c0_i32 = arith.constant 0 : i32
    %c0_i32_0 = arith.constant 0 : i32
    %c0_i32_1 = arith.constant 0 : i32
    return %c0_i32, %c0_i32_0 : i32, i32
  }
  func.func @transform_2(%arg0: i32) -> (i32, i32) {
    %c0_i32 = arith.constant 0 : i32
    %c0_i32_0 = arith.constant 0 : i32
    %c0_i32_1 = arith.constant 0 : i32
    return %c0_i32, %c0_i32_0 : i32, i32
  }
  func.func @transform_3(%arg0: i32) -> (i32, i32) {
    %c0_i32 = arith.constant 0 : i32
    %c0_i32_0 = arith.constant 0 : i32
    %c0_i32_1 = arith.constant 0 : i32
    return %c0_i32, %c0_i32_0 : i32, i32
  }
  func.func @transform_4(%arg0: i32) -> (i32, i32) {
    %c0_i32 = arith.constant 0 : i32
    %c0_i32_0 = arith.constant 0 : i32
    %c0_i32_1 = arith.constant 0 : i32
    return %c0_i32, %c0_i32_0 : i32, i32
  }
  func.func @transform_5(%arg0: i32) -> (i32, i32) {
    %c0_i32 = arith.constant 0 : i32
    %c0_i32_0 = arith.constant 0 : i32
    %c0_i32_1 = arith.constant 0 : i32
    return %c0_i32, %c0_i32_0 : i32, i32
  }
  func.func @transform_6(%arg0: i32) -> (i32, i32) {
    %c0_i32 = arith.constant 0 : i32
    %c0_i32_0 = arith.constant 0 : i32
    %c0_i32_1 = arith.constant 0 : i32
    return %c0_i32, %c0_i32_0 : i32, i32
  }
  func.func @transform_7(%arg0: i32) -> (i32, i32) {
    %c0_i32 = arith.constant 0 : i32
    %c0_i32_0 = arith.constant 0 : i32
    %c0_i32_1 = arith.constant 0 : i32
    return %c0_i32, %c0_i32_0 : i32, i32
  }
  func.func @transform_8(%arg0: i32) -> (i32, i32) {
    %c0_i32 = arith.constant 0 : i32
    %c0_i32_0 = arith.constant 0 : i32
    %c0_i32_1 = arith.constant 0 : i32
    return %c0_i32, %c0_i32_0 : i32, i32
  }
  func.func @transform_9(%arg0: i32) -> (i32, i32) {
    %c0_i32 = arith.constant 0 : i32
    %c0_i32_0 = arith.constant 0 : i32
    return %arg0, %c0_i32 : i32, i32
  }
}

</mosaic_0001>

<bundles_post_ra>
// kernel: dqn_forward.1
= control target key start
LH: loop header
LB: loop body
LE: loop exit
PB: predicated region body
PF: predicated region fallthrough
CT: control target
= control target key end

     0   :  { %14 = vsyncpa [#allocation3], 0  ;;  %s816_s0 = inlined_call_operand.vmem [shape: bf16[8,4], index: 0, kind: input, shape index: {}]   ;;  %s817_s1 = inlined_call_operand.vmem [shape: bf16[4,128], index: 1, kind: input, shape index: {}]   ;;  %s818_s2 = inlined_call_operand.vmem [shape: f32[1,128], index: 2, kind: input, shape index: {}]   ;;  %s819_s3 = inlined_call_operand.hbm [shape: bf16[128,128], index: 3, kind: input, shape index: {}]   ;;  %s820_s4 = inlined_call_operand.vmem [shape: f32[1,128], index: 4, kind: input, shape index: {}]   ;;  %s821_s5 = inlined_call_operand.hbm [shape: bf16[128,128], index: 5, kind: input, shape index: {}]   ;;  %s822_s6 = inlined_call_operand.vmem [shape: f32[1,128], index: 6, kind: input, shape index: {}]   ;;  %s823_s7 = inlined_call_operand.hbm [shape: bf16[128,128], index: 7, kind: input, shape index: {}]   ;;  %s824_s8 = inlined_call_operand.vmem [shape: f32[1,128], index: 8, kind: input, shape index: {}]   ;;  %s825_s9 = inlined_call_operand.vmem [shape: f32[8,128], index: 9, kind: output, shape index: {}]  }
   0x1   :  { %15 = vsyncpa [#allocation5], 0  ;;  %s696_s30 = smov [#allocation4]   ;;  %s697_s11 = smov [#allocation2]  }
   0x2   :  { %s41_s10 = sshll.u32 %s696_s30, 4  ;;  %s27_s12 = sshll.u32 %s697_s11, 4  ;;  %s42_s10 = int_to_ptr.vmem [resolvable:$true] %s41_s10  ;;  %s28_s12 = int_to_ptr.vmem [resolvable:$true] %s27_s12 }
   0x3   :  { %s640_s13 = scalar_lea.vmem %s42_s10, 1024  ;;  %p645_p1 = scmp.lt.s32.totalorder %s42_s10, %s42_s10 }
   0x4   :  { %p641_p0 = scmp.ne.s32.totalorder %s42_s10, %s640_s13  ;;  %p646_p2 = scmp.lt.s32.totalorder %s640_s13, %s640_s13 }
   0x6   :  { %p647_p3 = por %p646_p2, %p645_p1 }
   0x8   :  { %p648_p4 = pnand %p647_p3, %p641_p0 }
   0xa   :  { %651 = shalt.err (!%p648_p4)
}
   0xb   :  { %s698_s14 = smov 64   ;;  %s699_s15 = smov 4  }
   0xc   :  { %47 = dma.hbm_to_vmem [thread:$0]  %s821_s5, 1024, %s42_s10, [#allocation5], %s698_s14, %s698_s14, %s699_s15  }
   0xd   :  { %s660_s18 = scalar_lea.vmem %s28_s12, 1024  ;;  %p665_p6 = scmp.lt.s32.totalorder %s28_s12, %s28_s12 }
   0xe   :  { %p661_p5 = scmp.ne.s32.totalorder %s28_s12, %s660_s18  ;;  %p666_p7 = scmp.lt.s32.totalorder %s660_s18, %s660_s18 }
  0x10   :  { %p667_p8 = por %p666_p7, %p665_p6 }
  0x12   :  { %p668_p9 = pnand %p667_p8, %p661_p5 }
  0x14   :  { %671 = shalt.err (!%p668_p9)
}
  0x15   :  { %33 = dma.hbm_to_vmem [thread:$0]  %s819_s3, 1024, %s28_s12, [#allocation3], %s698_s14, %s698_s14, %s699_s15  }
  0x16   :  { %s700_s21 = smov [#allocation6]  }
  0x17   :  { %s55_s22 = sshll.u32 %s700_s21, 4  ;;  %s56_s22 = int_to_ptr.vmem [resolvable:$true] %s55_s22 }
  0x18   :  { %s680_s23 = scalar_lea.vmem %s56_s22, 1024  ;;  %p685_p11 = scmp.lt.s32.totalorder %s56_s22, %s56_s22 }
  0x19   :  { %p681_p10 = scmp.ne.s32.totalorder %s56_s22, %s680_s23  ;;  %p686_p12 = scmp.lt.s32.totalorder %s680_s23, %s680_s23 }
  0x1b   :  { %p687_p13 = por %p686_p12, %p685_p11 }
  0x1d   :  { %p688_p0 = pnand %p687_p13, %p681_p10 }
  0x1f   :  { %691 = shalt.err (!%p688_p0)
}
  0x20   :  { %61 = dma.hbm_to_vmem [thread:$0]  %s823_s7, 1024, %s56_s22, [#allocation5], %s698_s14, %s698_s14, %s699_s15  }
  0x21   :  { %692 = dma.done.wait [#allocation3], 1024  }
  0x22   :  { %693 = vsyncadd [#allocation3], 4294966272 }
  0x23   :  { %694 = dma.done.wait [#allocation5], 2048  }
  0x24   :  { %695 = vsyncadd [#allocation5], 4294965248  ;;  %v701_v0 = vmov 0.0   ;;  %vm702_vm0 = vmmov 0   ;;  %vm138_vm1 = vcmask 1041408   ;;  %vm134_vm2 = vcmask 31744  }
  0x25   :  { %535 = vmatprep.subr.bf16.mxu0 %v701_v0  ;;  %537 = vmatprep.mubr.msk.bf16.mxu0 %vm702_vm0, %v701_v0  ;;  %v75_v1 = vld [vmem:[%s817_s1] sm:$0x3]  ;;  %v608_v3 = vld [vmem:[#allocation2 + $0x38] sm:$0xff]   ;;  %v609_v5 = vld [vmem:[#allocation2 + $0x30] sm:$0xff]  }
  0x26   :  { %541 = vmatprep.subr.bf16.mxu1 %v701_v0  ;;  %557 = vmatprep.mubr.msk.bf16.mxu1 %vm702_vm0, %v701_v0  ;;  %v140_v2 = vsel %vm138_vm1, %v75_v1, 0  ;;  %v74_v4 = vld [vmem:[%s816_s0] sm:$0xf]  ;;  %v610_v6 = vld [vmem:[#allocation2 + $0x28] sm:$0xff]   ;;  %v612_v8 = vld [vmem:[#allocation2 + $0x18] sm:$0xff]  }
  0x27   :  { %536 = vmatpush3.bf16.msra.mxu0 %v140_v2  ;;  %542 = vmatpush3.bf16.msra.mxu1 %v608_v3  ;;  %v611_v7 = vld [vmem:[#allocation2 + $0x20] sm:$0xff]   ;;  %v613_v9 = vld [vmem:[#allocation2 + $0x10] sm:$0xff]   ;;  %v614_v10 = vld [vmem:[#allocation2 + $0x8] sm:$0xff]  }
  0x28   :  { %561 = vmatprep.subr.bf16.mxu0 %v701_v0  ;;  %543 = vmatprep.subr.bf16.mxu1 %v701_v0  ;;  %v615_v11 = vld [vmem:[#allocation2] sm:$0xff]   ;;  %v616_v12 = vld [vmem:[#allocation4 + $0x38] sm:$0xff]   ;;  %v617_v13 = vld [vmem:[#allocation4 + $0x30] sm:$0xff]  }
  0x29   :  { %v618_v14 = vld [vmem:[#allocation4 + $0x28] sm:$0xff]   ;;  %v619_v15 = vld [vmem:[#allocation4 + $0x20] sm:$0xff]   ;;  %v620_v16 = vld [vmem:[#allocation4 + $0x18] sm:$0xff]  }
  0x2a   :  { %538 = vmatmul.mubr.msk.bf16.vlgmr.msra.gmra.mxu0 %vm134_vm2, %v74_v4  ;;  %v621_v17 = vld [vmem:[#allocation4 + $0x10] sm:$0xff]   ;;  %v477_v18 = vld [vmem:[%s818_s2] ss:$0 sm:$0xff]  ;;  %v622_v26 = vld [vmem:[#allocation4 + $0x8] sm:$0xff]  }
  0x2b   :  { %577 = vmatprep.mubr.msk.bf16.mxu0 %vm702_vm0, %v701_v0  ;;  %544 = vmatpush3.bf16.msra.mxu1 %v609_v5  ;;  %v623_v27 = vld [vmem:[#allocation4] sm:$0xff]   ;;  %v624_v28 = vld [vmem:[#allocation6 + $0x38] sm:$0xff]   ;;  %v625_v29 = vld [vmem:[#allocation6 + $0x30] sm:$0xff]  }
  0x2c   :  { %545 = vmatprep.subr.bf16.mxu1 %v701_v0  ;;  %562 = vmatpush3.bf16.msra.mxu0 %v616_v12  ;;  %v626_v30 = vld [vmem:[#allocation6 + $0x28] sm:$0xff]   ;;  %v627_v31 = vld [vmem:[#allocation6 + $0x20] sm:$0xff]   ;;  %v628_v32 = vld [vmem:[#allocation6 + $0x18] sm:$0xff]  }
  0x2d   :  { %563 = vmatprep.subr.bf16.mxu0 %v701_v0  ;;  %v629_v33 = vld [vmem:[#allocation6 + $0x10] sm:$0xff]   ;;  %v479_v34 = vld [vmem:[%s820_s4] ss:$0 sm:$0xff]  ;;  %v630_v42 = vld [vmem:[#allocation6 + $0x8] sm:$0xff]  }
  0x2e   :  { %v631_v43 = vld [vmem:[#allocation6] sm:$0xff]  }
  0x2f   :  { %546 = vmatpush3.bf16.msra.mxu1 %v610_v6  ;;  %v488_v44 = vld [vmem:[%s822_s6] ss:$0 sm:$0xff] }
  0x30   :  { %547 = vmatprep.subr.bf16.mxu1 %v701_v0  ;;  %564 = vmatpush3.bf16.msra.mxu0 %v617_v13  ;;  %v497_v52 = vld [vmem:[%s824_s8] ss:$0 sm:$0xff] }
  0x31   :  { %565 = vmatprep.subr.bf16.mxu0 %v701_v0 }
  0x33   :  { %548 = vmatpush3.bf16.msra.mxu1 %v611_v7 }
  0x34   :  { %549 = vmatprep.subr.bf16.mxu1 %v701_v0  ;;  %566 = vmatpush3.bf16.msra.mxu0 %v618_v14 }
  0x35   :  { %567 = vmatprep.subr.bf16.mxu0 %v701_v0 }
  0x37   :  { %550 = vmatpush3.bf16.msra.mxu1 %v612_v8 }
  0x38   :  { %551 = vmatprep.subr.bf16.mxu1 %v701_v0  ;;  %568 = vmatpush3.bf16.msra.mxu0 %v619_v15 }
  0x39   :  { %569 = vmatprep.subr.bf16.mxu0 %v701_v0 }
  0x3b   :  { %552 = vmatpush3.bf16.msra.mxu1 %v613_v9 }
  0x3c   :  { %553 = vmatprep.subr.bf16.mxu1 %v701_v0  ;;  %570 = vmatpush3.bf16.msra.mxu0 %v620_v16 }
  0x3d   :  { %571 = vmatprep.subr.bf16.mxu0 %v701_v0 }
  0x3f   :  { %554 = vmatpush3.bf16.msra.mxu1 %v614_v10 }
  0x40   :  { %555 = vmatprep.subr.bf16.mxu1 %v701_v0  ;;  %572 = vmatpush3.bf16.msra.mxu0 %v621_v17 }
  0x41   :  { %573 = vmatprep.subr.bf16.mxu0 %v701_v0 }
  0x43   :  { %556 = vmatpush3.bf16.msra.mxu1 %v615_v11 }
  0x44   :  { %581 = vmatprep.subr.bf16.mxu1 %v701_v0  ;;  %574 = vmatpush3.bf16.msra.mxu0 %v622_v26 }
  0x45   :  { %575 = vmatprep.subr.bf16.mxu0 %v701_v0 }
  0x48   :  { %576 = vmatpush3.bf16.msra.mxu0 %v623_v27 }
  0xea   :  { %v176_v19 = vpop.f32.mrf.mxu0 }
  0xeb   :  { %v177_v20 = vadd.f32 %v477_v18, %v176_v19 }
  0xec   :  { %v539_v21 = vpop.f32.mrf.mxu0 }
  0xed   :  { %v182_v22 = vmax.f32 %v177_v20, 0.0 }
  0xee   :  { %v179_v23 = vpop.f32.mrf.mxu0 }
  0xef   :  { %v183_v24 = vpack.c.bf16 %v182_v22, %v182_v22 }
  0xf0   :  { %v540_v25 = vpop.f32.mrf.mxu0 }
  0xf1   :  { %558 = vmatmul.mubr.bf16.vlgmr.msra.gmra.mxu1 %v183_v24 }
  0xf2   :  { %597 = vmatprep.mubr.msk.bf16.mxu1 %vm702_vm0, %v701_v0  ;;  %582 = vmatpush3.bf16.msra.mxu1 %v624_v28 }
  0xf3   :  { %583 = vmatprep.subr.bf16.mxu1 %v701_v0 }
  0xf6   :  { %584 = vmatpush3.bf16.msra.mxu1 %v625_v29 }
  0xf7   :  { %585 = vmatprep.subr.bf16.mxu1 %v701_v0 }
  0xfa   :  { %586 = vmatpush3.bf16.msra.mxu1 %v626_v30 }
  0xfb   :  { %587 = vmatprep.subr.bf16.mxu1 %v701_v0 }
  0xfe   :  { %588 = vmatpush3.bf16.msra.mxu1 %v627_v31 }
  0xff   :  { %589 = vmatprep.subr.bf16.mxu1 %v701_v0 }
 0x102   :  { %590 = vmatpush3.bf16.msra.mxu1 %v628_v32 }
 0x103   :  { %591 = vmatprep.subr.bf16.mxu1 %v701_v0 }
 0x106   :  { %592 = vmatpush3.bf16.msra.mxu1 %v629_v33 }
 0x107   :  { %593 = vmatprep.subr.bf16.mxu1 %v701_v0 }
 0x10a   :  { %594 = vmatpush3.bf16.msra.mxu1 %v630_v42 }
 0x10b   :  { %595 = vmatprep.subr.bf16.mxu1 %v701_v0 }
 0x10e   :  { %596 = vmatpush3.bf16.msra.mxu1 %v631_v43 }
 0x1b1   :  { %v272_v35 = vpop.f32.mrf.mxu1 }
 0x1b2   :  { %v273_v36 = vadd.f32 %v479_v34, %v272_v35 }
 0x1b3   :  { %v559_v37 = vpop.f32.mrf.mxu1 }
 0x1b4   :  { %v278_v38 = vmax.f32 %v273_v36, 0.0 }
 0x1b5   :  { %v275_v39 = vpop.f32.mrf.mxu1 }
 0x1b6   :  { %v279_v40 = vpack.c.bf16 %v278_v38, %v278_v38 }
 0x1b7   :  { %v560_v41 = vpop.f32.mrf.mxu1 }
 0x1b8   :  { %578 = vmatmul.mubr.bf16.vlgmr.msra.gmra.mxu0 %v279_v40 }
 0x278   :  { %v368_v45 = vpop.f32.mrf.mxu0 }
 0x279   :  { %v369_v46 = vadd.f32 %v488_v44, %v368_v45 }
 0x27a   :  { %v579_v47 = vpop.f32.mrf.mxu0 }
 0x27b   :  { %v374_v48 = vmax.f32 %v369_v46, 0.0 }
 0x27c   :  { %v371_v49 = vpop.f32.mrf.mxu0 }
 0x27d   :  { %v375_v50 = vpack.c.bf16 %v374_v48, %v374_v48 }
 0x27e   :  { %v580_v51 = vpop.f32.mrf.mxu0 }
 0x27f   :  { %598 = vmatmul.mubr.bf16.vlgmr.msra.gmra.mxu1 %v375_v50 }
 0x33f   :  { %v464_v53 = vpop.f32.mrf.mxu1 }
 0x340   :  { %v465_v54 = vadd.f32 %v497_v52, %v464_v53 }
 0x341   :  { %v599_v55 = vpop.f32.mrf.mxu1 }
 0x342   :  { %470 = vst [vmem:[%s825_s9] sm:$0xff] %v465_v54 }
 0x343   :  { %v467_v56 = vpop.f32.mrf.mxu1 }
 0x345   :  { %v600_v57 = vpop.f32.mrf.mxu1 }
 0x346   :  { %475 = vsyncpa [#allocation3], 1 }
 0x347   :  { %476 = vsyncpa [#allocation5], 1 }

</bundles_post_ra>
